<compile_context>
chip_gen: v5e
topology: v5e:2x2
jax: 0.10.0
libtpu: 0.0.40
codegen_flags: <defaults>
</compile_context>

<pallas_src>
import jax
import jax.numpy as jnp
from jax.experimental import pallas as pl
from jax.experimental.pallas import tpu as pltpu

_LANE = 128
_SUBLANE = 8


def _round_up(x: int, m: int) -> int:
    return ((x + m - 1) // m) * m


def _head_kernel(x_ref, w1_ref, b1_ref, w2_ref, b2_ref, o_ref):
    # dense: [TB, Hp] @ [Hp, Hp] -> f32 accumulate on the MXU.
    h = jnp.dot(x_ref[...], w1_ref[...], preferred_element_type=jnp.float32)
    h = h + b1_ref[...]          # f32 bias add (VPU)
    h = jnp.tanh(h)              # f32 tanh (EUP slot — hides under the matmuls)
    # out_proj: [TB, Hp] @ [Hp, Lp].  Deliberate downcast of the activations
    # to the weight dtype (e.g. bf16) so the 2nd matmul runs at native MXU
    # rate; no-op in the all-f32 path.
    out = jnp.dot(h.astype(w2_ref.dtype), w2_ref[...],
                  preferred_element_type=jnp.float32)
    o_ref[...] = (out + b2_ref[...]).astype(o_ref.dtype)
    # TODO(synk): dropout is identity in eval mode; training-mode dropout would
    # need pltpu.prng_seed / pltpu.stateful_bernoulli masks here.


def prepare_head_params(w_dense, b_dense, w_out, b_out, *, compute_dtype=None):
    """One-time parameter prep (call once at model-load time).

    w_dense: [H, H] stored (in, out); w_out: [H, L] stored (in, out).
    Pads the contracted / output dims to lane-dense multiples of 128 (exact:
    zero-padded weight columns -> tanh(0)=0 activations that meet zero rows of
    the padded out_proj) and optionally casts weights to `compute_dtype`
    (use jnp.bfloat16 on v6e/v7x for full MXU rate).
    """
    H = w_dense.shape[0]
    L = w_out.shape[1]
    Hp = _round_up(max(H, _LANE), _LANE)
    Lp = _round_up(max(L, _LANE), _LANE)
    wdt = compute_dtype if compute_dtype is not None else w_dense.dtype

    if (H, H) == (Hp, Hp):
        w1 = w_dense.astype(wdt)
    else:
        w1 = jnp.zeros((Hp, Hp), dtype=wdt).at[:H, :H].set(w_dense.astype(wdt))
    if (H, L) == (Hp, Lp):
        w2 = w_out.astype(wdt)
    else:
        w2 = jnp.zeros((Hp, Lp), dtype=wdt).at[:H, :L].set(w_out.astype(wdt))

    b1 = jnp.zeros((1, Hp), dtype=jnp.float32).at[0, :H].set(
        b_dense.astype(jnp.float32))
    b2 = jnp.zeros((1, Lp), dtype=jnp.float32).at[0, :L].set(
        b_out.astype(jnp.float32))

    return {"w1": w1, "b1": b1, "w2": w2, "b2": b2,
            "hidden_size": H, "num_labels": L}


def wav2vec2_classification_head(features, params, *, batch_tile: int = 512):
    """features: [B, H] pooled hidden states.  Returns f32 logits [B, L]."""
    B, H = features.shape
    assert H == params["hidden_size"], "feature dim mismatch with prepared params"
    L = params["num_labels"]
    w1, b1, w2, b2 = params["w1"], params["b1"], params["w2"], params["b2"]
    Hp = w1.shape[0]
    Lp = w2.shape[1]

    # Feed the MXU with operands in the weight dtype (bf16 on v6e/v7x).
    x = features if features.dtype == w1.dtype else features.astype(w1.dtype)
    # Pad the feature dim only when H is not already lane-aligned.
    if H != Hp:
        x = jnp.zeros((B, Hp), dtype=x.dtype).at[:, :H].set(x)

    # Batch tile: multiple of 8 sublanes, capped so the grid has >= 2 tiles
    # whenever B allows it (v7x: both TensorCores get work).  If a single
    # tile covers everything, make the block exactly the batch size (block
    # dim == array dim is always a legal block shape).
    TB = min(batch_tile, _round_up(pl.cdiv(B, 2), _SUBLANE))
    if TB >= B:
        TB = B
    grid = (pl.cdiv(B, TB),)

    x_item = jnp.dtype(x.dtype).itemsize
    w_item = jnp.dtype(w1.dtype).itemsize

    cost = pl.CostEstimate(
        flops=2 * B * Hp * (Hp + Lp),
        transcendentals=B * Hp,
        bytes_accessed=(B * Hp * x_item
                        + (Hp * Hp + Hp * Lp) * w_item
                        + (Hp + Lp) * 4
                        + B * Lp * 4),
    )

    # VMEM budget: x double-buffer + single-buffered weights + biases +
    # double-buffered output + f32 intermediate h and its downcast.
    vmem_bytes = (2 * TB * Hp * x_item
                  + (Hp * Hp + Hp * Lp) * w_item
                  + 2 * _SUBLANE * (Hp + Lp) * 4
                  + 2 * TB * Lp * 4
                  + TB * Hp * (4 + w_item))
    vmem_limit = int(min(max(2 * vmem_bytes, 32 * 1024 * 1024),
                         64 * 1024 * 1024))

    out_padded = pl.pallas_call(
        _head_kernel,
        out_shape=jax.ShapeDtypeStruct((B, Lp), jnp.float32),
        grid_spec=pl.GridSpec(
            grid=grid,
            in_specs=[
                # features: batch-tiled, double-buffered (pipelines vs matmuls)
                pl.BlockSpec((TB, Hp), lambda i: (i, 0)),
                # weights / biases: constant block index -> VMEM-resident for
                # the whole batch loop; single-buffered (no wasted 2nd buffer).
                pl.BlockSpec((Hp, Hp), lambda i: (0, 0),
                             pipeline_mode=pl.Buffered(1)),
                pl.BlockSpec((1, Hp), lambda i: (0, 0),
                             pipeline_mode=pl.Buffered(1)),
                pl.BlockSpec((Hp, Lp), lambda i: (0, 0),
                             pipeline_mode=pl.Buffered(1)),
                pl.BlockSpec((1, Lp), lambda i: (0, 0),
                             pipeline_mode=pl.Buffered(1)),
            ],
            out_specs=pl.BlockSpec((TB, Lp), lambda i: (i, 0)),
        ),
        compiler_params=pltpu.CompilerParams(
            # No reduction axis -> safe to shard batch tiles across TCs (v7x).
            dimension_semantics=("parallel",),
            vmem_limit_bytes=vmem_limit),
        cost_estimate=cost,
    )(x, w1, b1, w2, b2)

    # Lane-padded label columns are exact zeros of the padded math; drop them.
    return out_padded[:, :L]


if __name__ == "__main__":
    # Small config consistent with the module: hidden_size=32, num_labels=5.
    B, H, L = 8, 32, 5
    key = jax.random.PRNGKey(0)
    k_x, k_w1, k_b1, k_w2, k_b2 = jax.random.split(key, 5)

    # features: pooled hidden states [B, H]
    x = jax.random.normal(k_x, (B, H), dtype=jnp.float32)

    # Deterministic "init" of nn.Linear params (stored transposed: [in, out]).
    w_dense = jax.random.normal(k_w1, (H, H), dtype=jnp.float32) * 0.05
    b_dense = jax.random.normal(k_b1, (H,), dtype=jnp.float32) * 0.05
    w_out = jax.random.normal(k_w2, (H, L), dtype=jnp.float32) * 0.05
    b_out = jax.random.normal(k_b2, (L,), dtype=jnp.float32) * 0.05

    # One-time parameter prep (padding/cast hoisted out of the forward call).
    params = prepare_head_params(w_dense, b_dense, w_out, b_out)

    logits = wav2vec2_classification_head(x, params)
    logits = jax.block_until_ready(logits)

    ref = jnp.tanh(x @ w_dense + b_dense) @ w_out + b_out
    assert logits.shape == (B, L)
    assert jnp.allclose(logits, ref, atol=1e-5, rtol=1e-5)

    # Exercise the ragged-batch path (grid > 1, partial last tile): B=12, TB=8.
    B2 = 12
    x2 = jax.random.normal(jax.random.PRNGKey(1), (B2, H), dtype=jnp.float32)
    logits2 = jax.block_until_ready(wav2vec2_classification_head(x2, params))
    ref2 = jnp.tanh(x2 @ w_dense + b_dense) @ w_out + b_out
    assert logits2.shape == (B2, L)
    assert jnp.allclose(logits2, ref2, atol=1e-5, rtol=1e-5)

    print("KERNEL_OK")
</pallas_src>

<mosaic_0001>
module attributes {stable_mosaic.version = 11 : i64} {
  func.func @_head_kernel(%arg0: i32, %arg1: memref<8x128xf32, #tpu.memory_space<vmem>>, %arg2: memref<128x128xf32, #tpu.memory_space<vmem>>, %arg3: memref<1x128xf32, #tpu.memory_space<vmem>>, %arg4: memref<128x128xf32, #tpu.memory_space<vmem>>, %arg5: memref<1x128xf32, #tpu.memory_space<vmem>>, %arg6: memref<8x128xf32, #tpu.memory_space<vmem>>) attributes {dimension_semantics = [#tpu.dimension_semantics<parallel>], iteration_bounds = array<i64: 1>, scalar_prefetch = 0 : i64, scratch_operands = 0 : i64, tpu.core_type = #tpu.core_type<tc>, window_params = [{transform_indices = @transform_0, window_bounds = array<i64: 8, 128>}, {pipeline_mode = #tpu.pipeline_mode<synchronous>, transform_indices = @transform_1, window_bounds = array<i64: 128, 128>}, {pipeline_mode = #tpu.pipeline_mode<synchronous>, transform_indices = @transform_2, window_bounds = array<i64: 1, 128>}, {pipeline_mode = #tpu.pipeline_mode<synchronous>, transform_indices = @transform_3, window_bounds = array<i64: 128, 128>}, {pipeline_mode = #tpu.pipeline_mode<synchronous>, transform_indices = @transform_4, window_bounds = array<i64: 1, 128>}, {transform_indices = @transform_5, window_bounds = array<i64: 8, 128>}]} {
    %c0 = arith.constant 0 : index
    %c0_0 = arith.constant 0 : index
    %0 = vector.load %arg1[%c0, %c0_0] : memref<8x128xf32, #tpu.memory_space<vmem>>, vector<8x128xf32>
    %c0_1 = arith.constant 0 : index
    %c0_2 = arith.constant 0 : index
    %1 = vector.load %arg2[%c0_1, %c0_2] : memref<128x128xf32, #tpu.memory_space<vmem>>, vector<128x128xf32>
    %cst = arith.constant dense<0.000000e+00> : vector<8x128xf32>
    %2 = tpu.matmul %0, %1, %cst {dimension_numbers = #tpu.dot_dimension_numbers<[1], [0], [0], [1], [0, 0, 1, 1], [], []>} : vector<8x128xf32>, vector<128x128xf32>, vector<8x128xf32> -> vector<8x128xf32>
    %c0_3 = arith.constant 0 : index
    %c0_4 = arith.constant 0 : index
    %3 = vector.load %arg3[%c0_3, %c0_4] : memref<1x128xf32, #tpu.memory_space<vmem>>, vector<1x128xf32>
    %4 = vector.broadcast %3 : vector<1x128xf32> to vector<8x128xf32>
    %5 = arith.addf %2, %4 : vector<8x128xf32>
    %6 = math.tanh %5 : vector<8x128xf32>
    %c0_5 = arith.constant 0 : index
    %c0_6 = arith.constant 0 : index
    %7 = vector.load %arg4[%c0_5, %c0_6] : memref<128x128xf32, #tpu.memory_space<vmem>>, vector<128x128xf32>
    %cst_7 = arith.constant dense<0.000000e+00> : vector<8x128xf32>
    %8 = tpu.matmul %6, %7, %cst_7 {dimension_numbers = #tpu.dot_dimension_numbers<[1], [0], [0], [1], [0, 0, 1, 1], [], []>} : vector<8x128xf32>, vector<128x128xf32>, vector<8x128xf32> -> vector<8x128xf32>
    %c0_8 = arith.constant 0 : index
    %c0_9 = arith.constant 0 : index
    %9 = vector.load %arg5[%c0_8, %c0_9] : memref<1x128xf32, #tpu.memory_space<vmem>>, vector<1x128xf32>
    %10 = vector.broadcast %9 : vector<1x128xf32> to vector<8x128xf32>
    %11 = arith.addf %8, %10 : vector<8x128xf32>
    %c0_10 = arith.constant 0 : index
    %c0_11 = arith.constant 0 : index
    %12 = vector.load %arg6[%c0_10, %c0_11] : memref<8x128xf32, #tpu.memory_space<vmem>>, vector<8x128xf32>
    tpu.vector_store %arg6[%c0_10, %c0_11], %11 {strides = array<i32>} : memref<8x128xf32, #tpu.memory_space<vmem>>, vector<8x128xf32>,
    return
  }
  func.func @transform_0(%arg0: i32) -> (i32, i32) {
    %c0_i32 = arith.constant 0 : i32
    %c0_i32_0 = arith.constant 0 : i32
    return %arg0, %c0_i32 : i32, i32
  }
  func.func @transform_1(%arg0: i32) -> (i32, i32) {
    %c0_i32 = arith.constant 0 : i32
    %c0_i32_0 = arith.constant 0 : i32
    %c0_i32_1 = arith.constant 0 : i32
    return %c0_i32, %c0_i32_0 : i32, i32
  }
  func.func @transform_2(%arg0: i32) -> (i32, i32) {
    %c0_i32 = arith.constant 0 : i32
    %c0_i32_0 = arith.constant 0 : i32
    %c0_i32_1 = arith.constant 0 : i32
    return %c0_i32, %c0_i32_0 : i32, i32
  }
  func.func @transform_3(%arg0: i32) -> (i32, i32) {
    %c0_i32 = arith.constant 0 : i32
    %c0_i32_0 = arith.constant 0 : i32
    %c0_i32_1 = arith.constant 0 : i32
    return %c0_i32, %c0_i32_0 : i32, i32
  }
  func.func @transform_4(%arg0: i32) -> (i32, i32) {
    %c0_i32 = arith.constant 0 : i32
    %c0_i32_0 = arith.constant 0 : i32
    %c0_i32_1 = arith.constant 0 : i32
    return %c0_i32, %c0_i32_0 : i32, i32
  }
  func.func @transform_5(%arg0: i32) -> (i32, i32) {
    %c0_i32 = arith.constant 0 : i32
    %c0_i32_0 = arith.constant 0 : i32
    return %arg0, %c0_i32 : i32, i32
  }
}

</mosaic_0001>

<bundles_post_ra>
// kernel: tpu_custom_call.1
= control target key start
LH: loop header
LB: loop body
LE: loop exit
PB: predicated region body
PF: predicated region fallthrough
CT: control target
= control target key end

     0   :  { %10 = vsyncpa [#allocation3], 0  ;;  %s333_s0 = inlined_call_operand.hbm [shape: f32[8,128], index: 0, kind: input, shape index: {}]   ;;  %s334_s1 = inlined_call_operand.hbm [shape: f32[128,128], index: 1, kind: input, shape index: {}]   ;;  %s335_s2 = inlined_call_operand.vmem [shape: f32[1,128], index: 2, kind: input, shape index: {}]   ;;  %s336_s3 = inlined_call_operand.hbm [shape: f32[128,128], index: 3, kind: input, shape index: {}]   ;;  %s337_s4 = inlined_call_operand.vmem [shape: f32[1,128], index: 4, kind: input, shape index: {}]   ;;  %s338_s5 = inlined_call_operand.hbm [shape: f32[8,128], index: 5, kind: output, shape index: {}]  }
   0x1   :  { %11 = vsyncpa [#allocation6], 0  ;;  %s28_s20 = sshll.u32 %s334_s1, 4  ;;  %s29_s20 = int_to_ptr.hbm [resolvable:$true] %s28_s20 }
   0x2   :  { %12 = vsyncpa [#allocation4], 0  ;;  %s279_s21 = smov [#allocation5]   ;;  %s18_s25 = sshll.u32 %s333_s0, 4  ;;  %s19_s25 = int_to_ptr.hbm [resolvable:$true] %s18_s25 }
   0x3   :  { %s30_s22 = sshll.u32 %s279_s21, 4  ;;  %s280_s26 = smov 128   ;;  %s31_s22 = int_to_ptr.vmem [resolvable:$true] %s30_s22 }
   0x4   :  { %s281_s27 = smov 8   ;;  %s282_s28 = smov [#allocation2]  }
   0x5   :  { %36 = dma.hbm_to_vmem [thread:$0]  %s29_s20, 2048, %s31_s22, [#allocation6], %s280_s26, %s280_s26, %s281_s27  }
   0x6   :  { %s20_s29 = sshll.u32 %s282_s28, 4  ;;  %s43_s7 = sshll.u32 %s336_s3, 4  ;;  %s21_s29 = int_to_ptr.vmem [resolvable:$true] %s20_s29  ;;  %s44_s7 = int_to_ptr.hbm [resolvable:$true] %s43_s7 }
   0x7   :  { %23 = dma.hbm_to_vmem [thread:$0]  %s19_s25, 128, %s21_s29, [#allocation3]  }
   0x8   :  { %s283_s1 = smov [#allocation7]  }
   0x9   :  { %s45_s8 = sshll.u32 %s283_s1, 4  ;;  %s46_s8 = int_to_ptr.vmem [resolvable:$true] %s45_s8 }
   0xa   :  { %51 = dma.hbm_to_vmem [thread:$0]  %s44_s7, 2048, %s46_s8, [#allocation6], %s280_s26, %s280_s26, %s281_s27  }
   0xb   :  { %273 = dma.done.wait [#allocation3], 128  }
   0xc   :  { %274 = vsyncadd [#allocation3], 4294967168 }
   0xd   :  { %275 = dma.done.wait [#allocation6], 4096  }
   0xe   :  { %276 = vsyncadd [#allocation6], 4294963200  ;;  %v82_v0 = vld [vmem:[#allocation5 + $0x78] sm:$0xff]  ;;  %v81_v1 = vld [vmem:[#allocation5 + $0x70] sm:$0xff]  ;;  %s284_s11 = smov [#allocation8]   ;;  %s156_s15 = sshll.u32 %s338_s5, 4  ;;  %s157_s15 = int_to_ptr.hbm [resolvable:$true] %s156_s15 }
   0xf   :  { %87 = vmatpush.msra.mxu0 %v82_v0  ;;  %v80_v2 = vld [vmem:[#allocation5 + $0x68] sm:$0xff]  ;;  %v79_v3 = vld [vmem:[#allocation5 + $0x60] sm:$0xff]  ;;  %v123_v4 = vld [vmem:[#allocation7 + $0x78] sm:$0xff]  ;;  %s154_s12 = sshll.u32 %s284_s11, 4  ;;  %s155_s12 = int_to_ptr.vmem [resolvable:$true] %s154_s12 }
  0x10   :  { %v78_v5 = vld [vmem:[#allocation5 + $0x58] sm:$0xff]  ;;  %128 = vmatpush.msra.mxu1 %v123_v4  ;;  %v122_v6 = vld [vmem:[#allocation7 + $0x70] sm:$0xff]  ;;  %v121_v7 = vld [vmem:[#allocation7 + $0x68] sm:$0xff] }
  0x11   :  { %88 = vmatpush.msra.mxu0 %v81_v1  ;;  %v77_v8 = vld [vmem:[#allocation5 + $0x50] sm:$0xff]  ;;  %v120_v9 = vld [vmem:[#allocation7 + $0x60] sm:$0xff]  ;;  %v76_v10 = vld [vmem:[#allocation5 + $0x48] sm:$0xff] }
  0x12   :  { %129 = vmatpush.msra.mxu1 %v122_v6  ;;  %v119_v11 = vld [vmem:[#allocation7 + $0x58] sm:$0xff]  ;;  %v75_v12 = vld [vmem:[#allocation5 + $0x40] sm:$0xff]  ;;  %v118_v13 = vld [vmem:[#allocation7 + $0x50] sm:$0xff] }
  0x13   :  { %89 = vmatpush.msra.mxu0 %v80_v2  ;;  %v74_v14 = vld [vmem:[#allocation5 + $0x38] sm:$0xff]  ;;  %v117_v15 = vld [vmem:[#allocation7 + $0x48] sm:$0xff]  ;;  %v73_v16 = vld [vmem:[#allocation5 + $0x30] sm:$0xff] }
  0x14   :  { %130 = vmatpush.msra.mxu1 %v121_v7  ;;  %v116_v17 = vld [vmem:[#allocation7 + $0x40] sm:$0xff]  ;;  %v72_v18 = vld [vmem:[#allocation5 + $0x28] sm:$0xff]  ;;  %v115_v19 = vld [vmem:[#allocation7 + $0x38] sm:$0xff] }
  0x15   :  { %90 = vmatpush.msra.mxu0 %v79_v3  ;;  %v71_v20 = vld [vmem:[#allocation5 + $0x20] sm:$0xff]  ;;  %v114_v21 = vld [vmem:[#allocation7 + $0x30] sm:$0xff]  ;;  %v70_v22 = vld [vmem:[#allocation5 + $0x18] sm:$0xff] }
  0x16   :  { %131 = vmatpush.msra.mxu1 %v120_v9  ;;  %v113_v23 = vld [vmem:[#allocation7 + $0x28] sm:$0xff]  ;;  %v69_v24 = vld [vmem:[#allocation5 + $0x10] sm:$0xff]  ;;  %v67_v26 = vld [vmem:[#allocation5] sm:$0xff] }
  0x17   :  { %91 = vmatpush.msra.mxu0 %v78_v5  ;;  %v68_v25 = vld [vmem:[#allocation5 + $0x8] sm:$0xff]  ;;  %v66_v27 = vld [vmem:[#allocation2] sm:$0xff]  ;;  %v112_v28 = vld [vmem:[#allocation7 + $0x20] sm:$0xff] }
  0x18   :  { %132 = vmatpush.msra.mxu1 %v119_v11  ;;  %v111_v29 = vld [vmem:[#allocation7 + $0x18] sm:$0xff]  ;;  %v110_v30 = vld [vmem:[#allocation7 + $0x10] sm:$0xff]  ;;  %v109_v31 = vld [vmem:[#allocation7 + $0x8] sm:$0xff] }
  0x19   :  { %92 = vmatpush.msra.mxu0 %v77_v8  ;;  %v108_v32 = vld [vmem:[#allocation7] sm:$0xff]  ;;  %v173_v33 = vld [vmem:[%s335_s2] ss:$0 sm:$0xff] }
  0x1a   :  { %133 = vmatpush.msra.mxu1 %v118_v13  ;;  %v174_v37 = vld [vmem:[%s337_s4] ss:$0 sm:$0xff] }
  0x1b   :  { %93 = vmatpush.msra.mxu0 %v76_v10 }
  0x1c   :  { %134 = vmatpush.msra.mxu1 %v117_v15 }
  0x1d   :  { %94 = vmatpush.msra.mxu0 %v75_v12 }
  0x1e   :  { %135 = vmatpush.msra.mxu1 %v116_v17 }
  0x1f   :  { %95 = vmatpush.msra.mxu0 %v74_v14 }
  0x20   :  { %136 = vmatpush.msra.mxu1 %v115_v19 }
  0x21   :  { %96 = vmatpush.msra.mxu0 %v73_v16 }
  0x22   :  { %137 = vmatpush.msra.mxu1 %v114_v21 }
  0x23   :  { %97 = vmatpush.msra.mxu0 %v72_v18 }
  0x24   :  { %138 = vmatpush.msra.mxu1 %v113_v23 }
  0x25   :  { %98 = vmatpush.msra.mxu0 %v71_v20 }
  0x26   :  { %139 = vmatpush.msra.mxu1 %v112_v28 }
  0x27   :  { %99 = vmatpush.msra.mxu0 %v70_v22 }
  0x28   :  { %140 = vmatpush.msra.mxu1 %v111_v29 }
  0x29   :  { %100 = vmatpush.msra.mxu0 %v69_v24 }
  0x2a   :  { %141 = vmatpush.msra.mxu1 %v110_v30 }
  0x2b   :  { %101 = vmatpush.msra.mxu0 %v68_v25 }
  0x2c   :  { %142 = vmatpush.msra.mxu1 %v109_v31 }
  0x2d   :  { %102 = vmatpush.msra.mxu0 %v67_v26 }
  0x2e   :  { %103 = vmatmul.f32.vlgmr.msra.gmra.mxu0 %v66_v27  ;;  %143 = vmatpush.msra.mxu1 %v108_v32 }
  0xab   :  { %v104_v34 = vpop.f32.mrf.mxu0 }
  0xac   :  { %v105_v35 = vadd.f32 %v173_v33, %v104_v34 }
  0xae   :  { %175 = vtanh.f32 %v105_v35 }
  0xb4   :  { %v176_v36 = vpop.eup %175 }
  0xb5   :  { %144 = vmatmul.f32.vlgmr.msra.gmra.mxu1 %v176_v36 }
 0x132   :  { %v145_v38 = vpop.f32.mrf.mxu1 }
 0x133   :  { %v146_v39 = vadd.f32 %v174_v37, %v145_v38 }
 0x135   :  { %148 = vst [vmem:[#allocation8] sm:$0xff] %v146_v39 }
 0x136   :  { %159 = dma.vmem_to_hbm [thread:$0]  %s155_s12, 128, %s157_s15, [#allocation4]  }
 0x137   :  { %277 = dma.done.wait [#allocation4], 128  }
 0x138   :  { %278 = vsyncadd [#allocation4], 4294967168 }
 0x139   :  { %164 = vsyncpa [#allocation3], 1 }
 0x13a   :  { %165 = vsyncpa [#allocation6], 1 }
 0x13b   :  { %166 = vsyncpa [#allocation4], 1 }

</bundles_post_ra>
